<compile_context>
chip_gen: v7x
topology: tpu7x:2x2x1
jax: 0.10.0
libtpu: 0.0.40
codegen_flags: <defaults>
</compile_context>

<pallas_src>
import functools
import math

import jax
import jax.numpy as jnp
from jax.experimental import pallas as pl
from jax.experimental.pallas import tpu as pltpu


def _gelu_exact(x):
    # nn.GELU() default = exact erf formulation (kept in f32).
    return 0.5 * x * (1.0 + jax.lax.erf(x * (1.0 / math.sqrt(2.0))))


def _round_up(x, m):
    return (x + m - 1) // m * m


def _vmem_cap_bytes():
    # Generation-aware cap (v5e/v6e: 128 MiB, v7x: 64 MiB per TensorCore),
    # leaving ~12.5% headroom for compiler-internal scratch.
    try:
        cap = getattr(pltpu.get_tpu_info(), "vmem_capacity_bytes", None)
        if cap:
            return int(cap) * 7 // 8
    except Exception:
        pass
    return 56 << 20  # conservative default = v7x minus headroom


def _dino_head_kernel(x_ref, w1_ref, b1_ref, w2_ref, b2_ref, w3_ref, b3_ref,
                      wl_ref, invw_ref, o_ref, z_ref, *, norm_last_layer):
    # ---- MLP + F.normalize(z): once per batch tile, hoisted to the j == 0
    # iteration of the (arbitrary, never core-sharded) out_dim axis. ----
    @pl.when(pl.program_id(1) == 0)
    def _():
        x = x_ref[...].astype(w1_ref.dtype)                 # MXU operands in weight dtype
        h = jnp.dot(x, w1_ref[...], preferred_element_type=jnp.float32) + b1_ref[...]
        h = _gelu_exact(h)                                   # f32 VPU/EUP math
        h = jnp.dot(h.astype(w2_ref.dtype), w2_ref[...],
                    preferred_element_type=jnp.float32) + b2_ref[...]
        h = _gelu_exact(h)
        z = jnp.dot(h.astype(w3_ref.dtype), w3_ref[...],
                    preferred_element_type=jnp.float32) + b3_ref[...]
        # x / max(||x||, 1e-12)  ==  x * rsqrt(max(||x||^2, 1e-24))  (EUP rsqrt)
        inv_norm = jax.lax.rsqrt(
            jnp.maximum(jnp.sum(z * z, axis=-1, keepdims=True), 1e-24))
        z_ref[...] = (z * inv_norm).astype(z_ref.dtype)

    # ---- last layer: pure MXU stream over w_last tiles, per (i, j).  The
    # column normalization is a per-column scale on the f32 accumulator. ----
    acc = jnp.dot(z_ref[...], wl_ref[...], preferred_element_type=jnp.float32)
    if norm_last_layer:
        acc = acc * invw_ref[...]                            # (1, tn) f32 broadcast
    o_ref[...] = acc.astype(o_ref.dtype)


def dino_head_forward(x, w1, b1, w2, b2, w3, b3, w_last, *,
                      norm_last_layer=True,
                      tm=None, tn=None,
                      out_dtype=jnp.bfloat16):
    """Weights are [in, out] (pre-transposed); biases [1, out]; w_last [bottleneck, out_dim].

    Weights are consumed in their STORED dtype (store the matmul weights in bf16
    for best perf) - no per-call cast of large parameters is materialized.
    """
    B, in_dim = x.shape
    hidden = w1.shape[1]
    bottleneck, out_dim = w_last.shape

    # ---- tile sizes: TM multiple of 16 (sublanes/bf16 packing), TN multiple of 128 ----
    b16 = _round_up(B, 16)
    if tm is None:
        if b16 <= 256:
            # Prefer >= 2 batch tiles (v7x megacore) when it adds no padding.
            tm = b16 // 2 if (b16 >= 32 and (b16 // 2) % 16 == 0) else b16
        else:
            tm = 256
    if tn is None:
        tn = min(2048, _round_up(out_dim, 128))
    b_pad = _round_up(B, tm)
    n_pad = _round_up(out_dim, tn)

    if b_pad != B:
        x = jnp.pad(x, ((0, b_pad - B), (0, 0)))

    # Per-column 1/||w_col|| in f32, computed once per forward (outside the grid)
    # and streamed as tiny (1, TN) tiles; applied to the f32 accumulator in-kernel.
    if norm_last_layer:
        inv_w = jax.lax.rsqrt(jnp.maximum(
            jnp.sum(jnp.square(w_last.astype(jnp.float32)), axis=0, keepdims=True),
            1e-24))
    else:
        inv_w = jnp.ones((1, out_dim), jnp.float32)

    wl = w_last
    if n_pad != out_dim:
        wl = jnp.pad(wl, ((0, 0), (0, n_pad - out_dim)))
        inv_w = jnp.pad(inv_w, ((0, 0), (0, n_pad - out_dim)))

    grid = (b_pad // tm, n_pad // tn)

    isz = lambda a: jnp.dtype(a.dtype).itemsize
    resident = 2 * (w1.size * isz(w1) + b1.size * isz(b1)
                    + w2.size * isz(w2) + b2.size * isz(b2)
                    + w3.size * isz(w3) + b3.size * isz(b3))          # MLP weights (2 bufs)
    streamed = 2 * (tm * in_dim * isz(x)
                    + bottleneck * tn * isz(wl)
                    + tn * 4
                    + tm * tn * jnp.dtype(out_dtype).itemsize)        # pipelined tiles
    scratch = tm * bottleneck * isz(wl)                               # persistent z
    vmem_limit = min(int(1.25 * (resident + streamed + scratch)) + (8 << 20),
                     _vmem_cap_bytes())

    kernel = functools.partial(_dino_head_kernel, norm_last_layer=norm_last_layer)

    out = pl.pallas_call(
        kernel,
        out_shape=jax.ShapeDtypeStruct((b_pad, n_pad), out_dtype),
        grid_spec=pltpu.PrefetchScalarGridSpec(
            num_scalar_prefetch=0,
            grid=grid,
            in_specs=[
                pl.BlockSpec((tm, in_dim), lambda i, j: (i, 0)),           # x
                pl.BlockSpec((in_dim, hidden), lambda i, j: (0, 0)),       # W1
                pl.BlockSpec((1, hidden), lambda i, j: (0, 0)),            # b1
                pl.BlockSpec((hidden, hidden), lambda i, j: (0, 0)),       # W2
                pl.BlockSpec((1, hidden), lambda i, j: (0, 0)),            # b2
                pl.BlockSpec((hidden, bottleneck), lambda i, j: (0, 0)),   # W3
                pl.BlockSpec((1, bottleneck), lambda i, j: (0, 0)),        # b3
                pl.BlockSpec((bottleneck, tn), lambda i, j: (0, j)),       # W_last (streamed)
                pl.BlockSpec((1, tn), lambda i, j: (0, j)),                # 1/||w_col||
            ],
            out_specs=pl.BlockSpec((tm, tn), lambda i, j: (i, j)),
            scratch_shapes=[pltpu.VMEM((tm, bottleneck), wl.dtype)],       # persistent z
        ),
        compiler_params=pltpu.CompilerParams(
            dimension_semantics=("parallel", "arbitrary"),
            vmem_limit_bytes=vmem_limit),
    )(x, w1, b1, w2, b2, w3, b3, wl, inv_w)

    if b_pad != B or n_pad != out_dim:
        out = out[:B, :out_dim]
    return out


def init_dino_head_params(key, in_dim, hidden_dim, out_dim, bottleneck_dim):
    ks = jax.random.split(key, 7)

    def linear(kw, kb, fan_in, fan_out):
        bound = 1.0 / math.sqrt(fan_in)
        # weight stored transposed: [fan_in, fan_out]
        w = jax.random.uniform(kw, (fan_in, fan_out), jnp.float32, -bound, bound)
        b = jax.random.uniform(kb, (1, fan_out), jnp.float32, -bound, bound)
        return w, b

    w1, b1 = linear(ks[0], ks[1], in_dim, hidden_dim)
    w2, b2 = linear(ks[2], ks[3], hidden_dim, hidden_dim)
    w3, b3 = linear(ks[4], ks[5], hidden_dim, bottleneck_dim)
    # last_layer.weight.data.normal_(mean=0.0, std=0.02), stored transposed.
    w_last = 0.02 * jax.random.normal(ks[6], (bottleneck_dim, out_dim), jnp.float32)
    return w1, b1, w2, b2, w3, b3, w_last


def cast_params_for_matmul(params, dtype=jnp.bfloat16):
    """One-time (outside the forward) cast of the matmul weights to the streaming
    dtype; biases stay f32 (added to the f32 accumulator)."""
    w1, b1, w2, b2, w3, b3, wl = params
    return (w1.astype(dtype), b1, w2.astype(dtype), b2, w3.astype(dtype), b3,
            wl.astype(dtype))


def dino_head_reference(x, w1, b1, w2, b2, w3, b3, w_last, norm_last_layer=True):
    h = _gelu_exact(x @ w1 + b1)
    h = _gelu_exact(h @ w2 + b2)
    z = h @ w3 + b3
    z = z / jnp.maximum(jnp.linalg.norm(z, axis=-1, keepdims=True), 1e-12)
    wl = w_last
    if norm_last_layer:
        wl = wl / jnp.maximum(jnp.linalg.norm(wl, axis=0, keepdims=True), 1e-12)
    return z @ wl


if __name__ == "__main__":
    # Small shapes consistent with DINOHead(in_dim, hidden_dim, out_dim, bottleneck_dim),
    # big enough to exercise a real (2 x 4) grid with tiled w_last streaming.
    B, in_dim, hidden_dim, bottleneck_dim, out_dim = 32, 64, 128, 64, 512
    tm, tn = 16, 128   # grid = (2 batch tiles, 4 out_dim tiles)

    key = jax.random.PRNGKey(0)
    kx, kp = jax.random.split(key)
    x = jax.random.normal(kx, (B, in_dim), jnp.float32)
    params_f32 = init_dino_head_params(kp, in_dim, hidden_dim, out_dim, bottleneck_dim)

    ref = dino_head_reference(x, *params_f32)

    # Default perf config: weights stored in bf16 (one-time cast, not per call),
    # f32 accumulation, per-column norm as f32 accumulator scale, bf16 output.
    params_bf16 = cast_params_for_matmul(params_f32, jnp.bfloat16)
    out_bf16 = jax.block_until_ready(
        dino_head_forward(x, *params_bf16, tm=tm, tn=tn))
    assert out_bf16.shape == (B, out_dim)
    assert out_bf16.dtype == jnp.bfloat16
    assert jnp.allclose(out_bf16.astype(jnp.float32), ref, atol=2e-2, rtol=2e-2), (
        float(jnp.max(jnp.abs(out_bf16.astype(jnp.float32) - ref))))

    # Full-f32 path: tight against the reference.
    out_f32 = jax.block_until_ready(
        dino_head_forward(x, *params_f32, tm=tm, tn=tn, out_dtype=jnp.float32))
    assert jnp.allclose(out_f32, ref, atol=1e-4, rtol=1e-4), (
        float(jnp.max(jnp.abs(out_f32 - ref))))

    print("KERNEL_OK")
</pallas_src>

<mosaic_0001>
module attributes {stable_mosaic.version = 11 : i64} {
  func.func @_dino_head_kernel(%arg0: i32, %arg1: i32, %arg2: memref<16x64xf32, #tpu.memory_space<vmem>>, %arg3: memref<64x128xbf16, #tpu.memory_space<vmem>>, %arg4: memref<1x128xf32, #tpu.memory_space<vmem>>, %arg5: memref<128x128xbf16, #tpu.memory_space<vmem>>, %arg6: memref<1x128xf32, #tpu.memory_space<vmem>>, %arg7: memref<128x64xbf16, #tpu.memory_space<vmem>>, %arg8: memref<1x64xf32, #tpu.memory_space<vmem>>, %arg9: memref<64x128xbf16, #tpu.memory_space<vmem>>, %arg10: memref<1x128xf32, #tpu.memory_space<vmem>>, %arg11: memref<16x128xbf16, #tpu.memory_space<vmem>>, %arg12: memref<16x64xbf16, #tpu.memory_space<vmem>>) attributes {dimension_semantics = [#tpu.dimension_semantics<parallel>, #tpu.dimension_semantics<arbitrary>], iteration_bounds = array<i64: 2, 4>, scalar_prefetch = 0 : i64, scratch_operands = 1 : i64, tpu.core_type = #tpu.core_type<tc>, window_params = [{transform_indices = @transform_0, window_bounds = array<i64: 16, 64>}, {pipeline_mode = #tpu.pipeline_mode<synchronous>, transform_indices = @transform_1, window_bounds = array<i64: 64, 128>}, {pipeline_mode = #tpu.pipeline_mode<synchronous>, transform_indices = @transform_2, window_bounds = array<i64: 1, 128>}, {pipeline_mode = #tpu.pipeline_mode<synchronous>, transform_indices = @transform_3, window_bounds = array<i64: 128, 128>}, {pipeline_mode = #tpu.pipeline_mode<synchronous>, transform_indices = @transform_4, window_bounds = array<i64: 1, 128>}, {pipeline_mode = #tpu.pipeline_mode<synchronous>, transform_indices = @transform_5, window_bounds = array<i64: 128, 64>}, {pipeline_mode = #tpu.pipeline_mode<synchronous>, transform_indices = @transform_6, window_bounds = array<i64: 1, 64>}, {transform_indices = @transform_7, window_bounds = array<i64: 64, 128>}, {transform_indices = @transform_8, window_bounds = array<i64: 1, 128>}, {transform_indices = @transform_9, window_bounds = array<i64: 16, 128>}]} {
    %c0_i32 = arith.constant 0 : i32
    %0 = arith.cmpi eq, %arg1, %c0_i32 : i32
    %1 = arith.extui %0 : i1 to i32
    %c0_i32_0 = arith.constant 0 : i32
    %2 = arith.cmpi ne, %1, %c0_i32_0 : i32
    scf.if %2 {
      %c0_8 = arith.constant 0 : index
      %c0_9 = arith.constant 0 : index
      %11 = vector.load %arg2[%c0_8, %c0_9] : memref<16x64xf32, #tpu.memory_space<vmem>>, vector<16x64xf32>
      %12 = arith.truncf %11 : vector<16x64xf32> to vector<16x64xbf16>
      %c0_10 = arith.constant 0 : index
      %c0_11 = arith.constant 0 : index
      %13 = vector.load %arg3[%c0_10, %c0_11] : memref<64x128xbf16, #tpu.memory_space<vmem>>, vector<64x128xbf16>
      %cst_12 = arith.constant dense<0.000000e+00> : vector<16x128xf32>
      %14 = tpu.matmul %12, %13, %cst_12 {dimension_numbers = #tpu.dot_dimension_numbers<[1], [0], [0], [1], [0, 0, 1, 1], [], []>} : vector<16x64xbf16>, vector<64x128xbf16>, vector<16x128xf32> -> vector<16x128xf32>
      %c0_13 = arith.constant 0 : index
      %c0_14 = arith.constant 0 : index
      %15 = vector.load %arg4[%c0_13, %c0_14] : memref<1x128xf32, #tpu.memory_space<vmem>>, vector<1x128xf32>
      %16 = vector.broadcast %15 : vector<1x128xf32> to vector<16x128xf32>
      %17 = arith.addf %14, %16 : vector<16x128xf32>
      %cst_15 = arith.constant 5.000000e-01 : f32
      %18 = vector.broadcast %cst_15 : f32 to vector<16x128xf32>
      %19 = arith.mulf %18, %17 : vector<16x128xf32>
      %cst_16 = arith.constant 0.707106769 : f32
      %20 = vector.broadcast %cst_16 : f32 to vector<16x128xf32>
      %21 = arith.mulf %17, %20 : vector<16x128xf32>
      %22 = math.erf %21 : vector<16x128xf32>
      %cst_17 = arith.constant 1.000000e+00 : f32
      %23 = vector.broadcast %cst_17 : f32 to vector<16x128xf32>
      %24 = arith.addf %23, %22 : vector<16x128xf32>
      %25 = arith.mulf %19, %24 : vector<16x128xf32>
      %26 = arith.truncf %25 : vector<16x128xf32> to vector<16x128xbf16>
      %c0_18 = arith.constant 0 : index
      %c0_19 = arith.constant 0 : index
      %27 = vector.load %arg5[%c0_18, %c0_19] : memref<128x128xbf16, #tpu.memory_space<vmem>>, vector<128x128xbf16>
      %cst_20 = arith.constant dense<0.000000e+00> : vector<16x128xf32>
      %28 = tpu.matmul %26, %27, %cst_20 {dimension_numbers = #tpu.dot_dimension_numbers<[1], [0], [0], [1], [0, 0, 1, 1], [], []>} : vector<16x128xbf16>, vector<128x128xbf16>, vector<16x128xf32> -> vector<16x128xf32>
      %c0_21 = arith.constant 0 : index
      %c0_22 = arith.constant 0 : index
      %29 = vector.load %arg6[%c0_21, %c0_22] : memref<1x128xf32, #tpu.memory_space<vmem>>, vector<1x128xf32>
      %30 = vector.broadcast %29 : vector<1x128xf32> to vector<16x128xf32>
      %31 = arith.addf %28, %30 : vector<16x128xf32>
      %cst_23 = arith.constant 5.000000e-01 : f32
      %32 = vector.broadcast %cst_23 : f32 to vector<16x128xf32>
      %33 = arith.mulf %32, %31 : vector<16x128xf32>
      %cst_24 = arith.constant 0.707106769 : f32
      %34 = vector.broadcast %cst_24 : f32 to vector<16x128xf32>
      %35 = arith.mulf %31, %34 : vector<16x128xf32>
      %36 = math.erf %35 : vector<16x128xf32>
      %cst_25 = arith.constant 1.000000e+00 : f32
      %37 = vector.broadcast %cst_25 : f32 to vector<16x128xf32>
      %38 = arith.addf %37, %36 : vector<16x128xf32>
      %39 = arith.mulf %33, %38 : vector<16x128xf32>
      %40 = arith.truncf %39 : vector<16x128xf32> to vector<16x128xbf16>
      %c0_26 = arith.constant 0 : index
      %c0_27 = arith.constant 0 : index
      %41 = vector.load %arg7[%c0_26, %c0_27] : memref<128x64xbf16, #tpu.memory_space<vmem>>, vector<128x64xbf16>
      %cst_28 = arith.constant dense<0.000000e+00> : vector<16x64xf32>
      %42 = tpu.matmul %40, %41, %cst_28 {dimension_numbers = #tpu.dot_dimension_numbers<[1], [0], [0], [1], [0, 0, 1, 1], [], []>} : vector<16x128xbf16>, vector<128x64xbf16>, vector<16x64xf32> -> vector<16x64xf32>
      %c0_29 = arith.constant 0 : index
      %c0_30 = arith.constant 0 : index
      %43 = vector.load %arg8[%c0_29, %c0_30] : memref<1x64xf32, #tpu.memory_space<vmem>>, vector<1x64xf32>
      %44 = vector.broadcast %43 : vector<1x64xf32> to vector<16x64xf32>
      %45 = arith.addf %42, %44 : vector<16x64xf32>
      %46 = arith.mulf %45, %45 : vector<16x64xf32>
      %cst_31 = arith.constant dense<0.000000e+00> : vector<16xf32>
      %47 = vector.multi_reduction <add>, %46, %cst_31 [1] : vector<16x64xf32> to vector<16xf32>
      %48 = vector.shape_cast %47 : vector<16xf32> to vector<16x1xf32>
      %cst_32 = arith.constant 1.000000e-24 : f32
      %49 = vector.broadcast %cst_32 : f32 to vector<16x1xf32>
      %50 = arith.maximumf %48, %49 : vector<16x1xf32>
      %51 = math.rsqrt %50 : vector<16x1xf32>
      %52 = vector.broadcast %51 : vector<16x1xf32> to vector<16x64xf32>
      %53 = arith.mulf %45, %52 : vector<16x64xf32>
      %54 = arith.truncf %53 : vector<16x64xf32> to vector<16x64xbf16>
      %c0_33 = arith.constant 0 : index
      %c0_34 = arith.constant 0 : index
      %55 = vector.load %arg12[%c0_33, %c0_34] : memref<16x64xbf16, #tpu.memory_space<vmem>>, vector<16x64xbf16>
      tpu.vector_store %arg12[%c0_33, %c0_34], %54 {strides = array<i32>} : memref<16x64xbf16, #tpu.memory_space<vmem>>, vector<16x64xbf16>,
    } else {
    }
    %c0 = arith.constant 0 : index
    %c0_1 = arith.constant 0 : index
    %3 = vector.load %arg12[%c0, %c0_1] : memref<16x64xbf16, #tpu.memory_space<vmem>>, vector<16x64xbf16>
    %c0_2 = arith.constant 0 : index
    %c0_3 = arith.constant 0 : index
    %4 = vector.load %arg9[%c0_2, %c0_3] : memref<64x128xbf16, #tpu.memory_space<vmem>>, vector<64x128xbf16>
    %cst = arith.constant dense<0.000000e+00> : vector<16x128xf32>
    %5 = tpu.matmul %3, %4, %cst {dimension_numbers = #tpu.dot_dimension_numbers<[1], [0], [0], [1], [0, 0, 1, 1], [], []>} : vector<16x64xbf16>, vector<64x128xbf16>, vector<16x128xf32> -> vector<16x128xf32>
    %c0_4 = arith.constant 0 : index
    %c0_5 = arith.constant 0 : index
    %6 = vector.load %arg10[%c0_4, %c0_5] : memref<1x128xf32, #tpu.memory_space<vmem>>, vector<1x128xf32>
    %7 = vector.broadcast %6 : vector<1x128xf32> to vector<16x128xf32>
    %8 = arith.mulf %5, %7 : vector<16x128xf32>
    %9 = arith.truncf %8 : vector<16x128xf32> to vector<16x128xbf16>
    %c0_6 = arith.constant 0 : index
    %c0_7 = arith.constant 0 : index
    %10 = vector.load %arg11[%c0_6, %c0_7] : memref<16x128xbf16, #tpu.memory_space<vmem>>, vector<16x128xbf16>
    tpu.vector_store %arg11[%c0_6, %c0_7], %9 {strides = array<i32>} : memref<16x128xbf16, #tpu.memory_space<vmem>>, vector<16x128xbf16>,
    return
  }
  func.func @transform_0(%arg0: i32, %arg1: i32) -> (i32, i32) {
    %c0_i32 = arith.constant 0 : i32
    %c0_i32_0 = arith.constant 0 : i32
    return %arg0, %c0_i32 : i32, i32
  }
  func.func @transform_1(%arg0: i32, %arg1: i32) -> (i32, i32) {
    %c0_i32 = arith.constant 0 : i32
    %c0_i32_0 = arith.constant 0 : i32
    %c0_i32_1 = arith.constant 0 : i32
    return %c0_i32, %c0_i32_0 : i32, i32
  }
  func.func @transform_2(%arg0: i32, %arg1: i32) -> (i32, i32) {
    %c0_i32 = arith.constant 0 : i32
    %c0_i32_0 = arith.constant 0 : i32
    %c0_i32_1 = arith.constant 0 : i32
    return %c0_i32, %c0_i32_0 : i32, i32
  }
  func.func @transform_3(%arg0: i32, %arg1: i32) -> (i32, i32) {
    %c0_i32 = arith.constant 0 : i32
    %c0_i32_0 = arith.constant 0 : i32
    %c0_i32_1 = arith.constant 0 : i32
    return %c0_i32, %c0_i32_0 : i32, i32
  }
  func.func @transform_4(%arg0: i32, %arg1: i32) -> (i32, i32) {
    %c0_i32 = arith.constant 0 : i32
    %c0_i32_0 = arith.constant 0 : i32
    %c0_i32_1 = arith.constant 0 : i32
    return %c0_i32, %c0_i32_0 : i32, i32
  }
  func.func @transform_5(%arg0: i32, %arg1: i32) -> (i32, i32) {
    %c0_i32 = arith.constant 0 : i32
    %c0_i32_0 = arith.constant 0 : i32
    %c0_i32_1 = arith.constant 0 : i32
    return %c0_i32, %c0_i32_0 : i32, i32
  }
  func.func @transform_6(%arg0: i32, %arg1: i32) -> (i32, i32) {
    %c0_i32 = arith.constant 0 : i32
    %c0_i32_0 = arith.constant 0 : i32
    %c0_i32_1 = arith.constant 0 : i32
    return %c0_i32, %c0_i32_0 : i32, i32
  }
  func.func @transform_7(%arg0: i32, %arg1: i32) -> (i32, i32) {
    %c0_i32 = arith.constant 0 : i32
    %c0_i32_0 = arith.constant 0 : i32
    return %c0_i32, %arg1 : i32, i32
  }
  func.func @transform_8(%arg0: i32, %arg1: i32) -> (i32, i32) {
    %c0_i32 = arith.constant 0 : i32
    %c0_i32_0 = arith.constant 0 : i32
    return %c0_i32, %arg1 : i32, i32
  }
  func.func @transform_9(%arg0: i32, %arg1: i32) -> (i32, i32) {
    %c0_i32 = arith.constant 0 : i32
    return %arg0, %arg1 : i32, i32
  }
}

</mosaic_0001>

<bundles_post_ra>
// kernel: tpu_custom_call.1
= control target key start
LH: loop header
LB: loop body
LE: loop exit
PB: predicated region body
PF: predicated region fallthrough
CT: control target
= control target key end

     0   :  { %s1958_s0 = inlined_call_operand.vmem [shape: f32[32,64], index: 0, kind: input, shape index: {}]   ;;  %s1959_s1 = inlined_call_operand.hbm [shape: bf16[64,128], index: 1, kind: input, shape index: {}]   ;;  %s1960_s2 = inlined_call_operand.vmem [shape: f32[1,128], index: 2, kind: input, shape index: {}]   ;;  %s1961_s3 = inlined_call_operand.vmem [shape: bf16[128,128], index: 3, kind: input, shape index: {}]   ;;  %s1962_s4 = inlined_call_operand.vmem [shape: f32[1,128], index: 4, kind: input, shape index: {}]   ;;  %s1963_s5 = inlined_call_operand.vmem [shape: bf16[128,64], index: 5, kind: input, shape index: {}]   ;;  %s1964_s6 = inlined_call_operand.vmem [shape: f32[1,64], index: 6, kind: input, shape index: {}]   ;;  %s1965_s7 = inlined_call_operand.hbm [shape: bf16[64,512], index: 7, kind: input, shape index: {}]   ;;  %s1966_s8 = inlined_call_operand.vmem [shape: f32[1,512], index: 8, kind: input, shape index: {}]   ;;  %s1967_s9 = inlined_call_operand.hbm [shape: bf16[32,512], index: 9, kind: output, shape index: {}]  }
   0x1   :  { %1984 = sst [smem:[#allocation17_spill]] %s1959_s1 }
   0x2   :  { %1985 = sst [smem:[#allocation18_spill]] %s1960_s2 }
   0x3   :  { %1986 = sst [smem:[#allocation19_spill]] %s1962_s4 }
   0x4   :  { %1987 = sst [smem:[#allocation20_spill]] %s1964_s6 }
   0x5   :  { %1988 = sst [smem:[#allocation21_spill]] %s1967_s9 }
   0x6   :  { %14 = vsyncpa [#allocation4], 0 }
   0x7   :  { %15 = vsyncpa [#allocation7], 0 }
   0x8   :  { %17 = vsyncpa [#allocation7 + $0x1], 0 }
   0x9   :  { %18 = vsyncpa [#allocation5], 0 }
   0xa   :  { %20 = vsyncpa [#allocation5 + $0x1], 0  ;;  %s1562_s30 = smov 0   ;;  %s1564_s10 = smov 0  }
   0xb   :  { %s1566_s11 = smov 0   ;;  %s1568_s12 = smov 0  }
   0xc   :  { %s1570_s13 = smov 0   ;;  %s1572_s14 = smov 0  }
   0xd   :  { %s1574_s15 = smov 0   ;;  %s1576_s16 = smov 0  }
   0xe   :  { %s1578_s17 = smov 0   ;;  %s1580_s18 = smov 0  }
   0xf   :  { %s1582_s19 = smov 0  }
  0x10 LB: > { %1989 = sst [smem:[#allocation12_spill]] %s1457_s30  ;;  %s1002_s20 = sadd.s32 4294967295, %s1497_s19   ;;  %s1497_s19 = sphi %s1582_s19, %s26_s19   ;;  %s1493_s18 = sphi %s1580_s18, %s2031_s18   ;;  %s1489_s17 = sphi %s1578_s17, %s2030_s17   ;;  %s1485_s16 = sphi %s1576_s16, %s2029_s16   ;;  %s1481_s15 = sphi %s1574_s15, %s2028_s15   ;;  %s1477_s14 = sphi %s1572_s14, %s2027_s14   ;;  %s1473_s13 = sphi %s1570_s13, %s2026_s13   ;;  %s1469_s12 = sphi %s1568_s12, %s2025_s12   ;;  %s1465_s11 = sphi %s1566_s11, %s2024_s11   ;;  %s1461_s10 = sphi %s1564_s10, %s2023_s10   ;;  %s1457_s30 = sphi %s1562_s30, %s2022_s30  }
  0x11   : > { %1990 = sst [smem:[#allocation13_spill]] %s1497_s19  ;;  %s1003_s21 = sadd.s32 4294967294, %s1497_s19  }
  0x12   : > { %p204_p0 = scmp.ne.s32.totalorder %s1477_s14, %s1473_s13  ;;  %p205_p1 = scmp.eq.s32.totalorder %s1497_s19, 0 }
  0x13   : > { %p210_p2 = scmp.ne.s32.totalorder %s1473_s13, %s1469_s12  ;;  %p1622_p3 = scmp.eq.s32.totalorder %s1002_s20, 0 }
  0x14   : > { %p1627_p4 = por %p205_p1, %p204_p0  ;;  %p261_p5 = scmp.ne.s32.totalorder %s1465_s11, %s1461_s10 }
  0x15   : > { %s1991_s23 = scalar_select %p1622_p3, 1, 0 }
  0x16   : > { %p1635_p6 = por %p1622_p3, %p210_p2  ;;  %p262_p7 = scmp.eq.s32.totalorder %s1002_s20, 7 }
  0x17   : > { %p267_p8 = scmp.ne.s32.totalorder %s1461_s10, %s1457_s30  ;;  %p268_p9 = scmp.eq.s32.totalorder %s1003_s21, 7 }
  0x18   : > { %s1993_s26 = scalar_select %p1635_p6, 1, 0 }
  0x19   : > { %p1641_p10 = por %p262_p7, %p261_p5  ;;  %p1004_p11 = scmp.ge.s32.totalorder %s1497_s19, 1 }
  0x1a   : > { %p1646_p12 = por %p268_p9, %p267_p8  ;;  %p275_p13 = scmp.lt.s32.totalorder %s1497_s19, 9 }
  0x1b   : > { %s1994_s27 = scalar_select %p1641_p10, 1, 0 }
  0x1c   : > { %s1996_s28 = scalar_select %p1646_p12, 1, 0 }
  0x1d   : > { %1995 = sst [smem:[#allocation14_spill]] %s1994_s27  ;;  %p1651_p0 = pnand %p1004_p11, %p275_p13 }
  0x1e   : > { %1997 = sst [smem:[#allocation15_spill]] %s1996_s28  ;;  %s1499_s12 = smov [#allocation3]  }
  0x1f   : > { %s1998_s29 = scalar_select %p1651_p0, 1, 0 }
  0x20   : > { %s287_s24 = sshll.u32 %s1499_s12, 4  ;;  %p1162_p1 = pneg %p1651_p0  ;;  %s288_s24 = int_to_ptr.vmem [resolvable:$true] %s287_s24 }
  0x21   : > { %p1175_p2 = scmp.lt.s32.totalorder %s1497_s19, 8  ;;  %s2001_s1 = sld [smem:[#allocation17_spill]] }
  0x22   : > { %p1660_p5 = pnand %p1162_p1, %p1622_p3 }
  0x23   : > { %p1666_p7 = pnand %p1175_p2, %p1627_p4 }
  0x24   : > { %p1315_p9 = pneg %p1660_p5 }
  0x25   : > { %s2000_s21 = scalar_select %p1666_p7, 1, 0 }
  0x27   : > { %s1313_s30 = scalar_lea.hbm %s2001_s1, 512 }
  0x28   : > { %p1314_p8 = scmp.ne.s32.totalorder %s2001_s1, %s1313_s30  ;;  %p1320_p1 = scmp.lt.u32.totalorder %s1313_s30, %s2001_s1 }
  0x2a   : > { %p1316_p11 = pnand %p1315_p9, %p1314_p8 }
  0x2c   : > { %p1317_p13 = pneg %p1316_p11 }
  0x2e   : > { %p1322_p4 = pnand %p1320_p1, %p1317_p13 }
  0x30   : > { %1325 = shalt.err (!%p1322_p4)
}
  0x31   : > { %s1326_s25 = scalar_lea.vmem %s288_s24, 512  ;;  %p1334_p6 = scmp.lt.s32.totalorder %s288_s24, %s288_s24 }
  0x32   : > { %p1327_p2 = scmp.ne.s32.totalorder %s288_s24, %s1326_s25  ;;  %p1335_p3 = scmp.lt.s32.totalorder %s1326_s25, %s1326_s25 }
  0x34   : > { %p1329_p12 = pnand %p1327_p2, %p1315_p9  ;;  %p1336_p0 = por %p1335_p3, %p1334_p6 }
  0x36   : > { %p1330_p10 = pneg %p1329_p12 }
  0x38   : > { %p1337_p7 = pnand %p1336_p0, %p1330_p10 }
  0x3a   : > { %1340 = shalt.err (!%p1337_p7)
}
  0x3b   : > { %s1981_s9 = smov 64   ;;  %s1982_s30 = smov 4  }
  0x3c   : > { %1165 = dma.hbm_to_vmem [thread:$0]  (!%p1660_p5), %s2001_s1, 512, %s288_s24, [#allocation4], %s1981_s9, %s1981_s9, %s1982_s30  }
  0x3d   : > { %s35_s27 = sadd.s32 1, %s1489_s17  ;;  %s38_s28 = sadd.s32 1, %s1493_s18 }
  0x3e   : > { %p36_p3 = scmp.ge.s32.totalorder %s35_s27, 4  ;;  %s325_s12 = sand.u32 1, %s1477_s14  }
  0x3f   : > { %s1007_s25 = sshll.u32 %s325_s12, 5  ;;  %s1008_s6 = sshll.u32 %s1489_s17, 6 }
  0x40   : > { %s2033_s27 = smov (%p36_p3, %s35_s27), 0  ;;  %s2035_s28 = smov (!%p36_p3, %s38_s28), %s1493_s18 }
  0x41   : > { %2002 = sst [smem:[#allocation16_spill]] %s2033_s27  ;;  %s194_s20 = ssub.s32 %s1489_s17, %s2033_s27 }
  0x42   : > { %p40_p6 = scmp.ge.s32.totalorder %s2035_s28, 2  ;;  %p195_p10 = scmp.eq.s32.totalorder %s194_s20, 0 }
  0x43   : > { %s329_s19 = scalar_lea.vmem [#allocation6], %s1007_s25  ;;  %s2003_s24 = sadd.s32 1, %s1477_s14 }
  0x44   : > { %s335_s22 = sshll.u32 %s329_s19, 4  ;;  %s2037_s28 = smov (%p40_p6, %s2035_s28), 0  ;;  %s1714_s22 = int_to_ptr.vmem [resolvable:$true] %s335_s22 }
  0x45   : > { %s1703_s9 = scalar_select %p195_p10, %s1477_s14, %s2003_s24  }
  0x46   : > { %s246_s30 = ssub.s32 %s1493_s18, %s2037_s28  ;;  %s1710_s2 = scalar_lea.hbm %s1965_s7, %s1008_s6 }
  0x47   : > { %s1712_s27 = sor.u32 %s246_s30, %s194_s20  ;;  %s1717_s25 = scalar_lea.sflag [#allocation7], %s325_s12 }
  0x48   : > { %p249_p12 = scmp.eq.s32.totalorder %s1712_s27, 0  ;;  %s1341_s19 = scalar_lea.hbm %s1710_s2, 512 }
  0x49   : > { %p1342_p0 = scmp.ne.s32.totalorder %s1710_s2, %s1341_s19  ;;  %p2004_p5 = scmp.ne.s32.totalorder %s2000_s21, 0 }
  0x4a   : > { %s1346_s6 = scalar_lea.hbm %s1965_s7, 2048  ;;  %p1347_p11 = scmp.lt.u32.totalorder %s1710_s2, %s1965_s7 }
  0x4b   : > { %p1343_p7 = pneg %p2004_p5  ;;  %p1348_p13 = scmp.lt.u32.totalorder %s1346_s6, %s1341_s19 }
  0x4c   : > { %p1350_p4 = scmp.lt.u32.totalorder %s1341_s19, %s1710_s2 }
  0x4d   : > { %p1344_p8 = pnand %p1343_p7, %p1342_p0  ;;  %p1349_p1 = por %p1348_p13, %p1347_p11 }
  0x4f   : > { %p1345_p9 = pneg %p1344_p8  ;;  %p1351_p2 = por %p1350_p4, %p1349_p1 }
  0x51   : > { %p1352_p3 = pnand %p1351_p2, %p1345_p9 }
  0x53   : > { %1355 = shalt.err (!%p1352_p3)
}
  0x54   : > { %s1356_s12 = scalar_lea.vmem %s1714_s22, 512  ;;  %s1502_s24 = smov [#allocation6]  }
  0x55   : > { %p1357_p6 = scmp.ne.s32.totalorder %s1714_s22, %s1356_s12  ;;  %s1361_s1 = sshll.u32 %s1502_s24, 4  ;;  %s1362_s1 = int_to_ptr.vmem [resolvable:$false] %s1361_s1 }
  0x56   : > { %s1363_s4 = scalar_lea.vmem %s1362_s1, 1024  ;;  %p1364_p8 = scmp.lt.s32.totalorder %s1714_s22, %s1362_s1 }
  0x57   : > { %p1359_p10 = pnand %p1357_p6, %p1343_p7  ;;  %p1365_p11 = scmp.lt.s32.totalorder %s1363_s4, %s1356_s12 }
  0x59   : > { %p1360_p0 = pneg %p1359_p10  ;;  %p1366_p13 = por %p1365_p11, %p1364_p8 }
  0x5b   : > { %p1367_p1 = pnand %p1366_p13, %p1360_p0 }
  0x5d   : > { %1370 = shalt.err (!%p1367_p1)
}
  0x5e   : > { %s1503_s19 = smov 256   ;;  %s2005_s6 = smov 4  }
  0x5f   : > { %s2006_s30 = smov 64   ;;  %s2007_s20 = sadd.s32 1, %s1465_s11 }
  0x60   : > { %1169 = dma.hbm_to_vmem [thread:$0]  (!%p2004_p5), %s1710_s2, 512, %s1714_s22, %s1717_s25, %s1503_s19, %s2006_s30, %s2005_s6  }
  0x61   : > { %s1752_s24 = scalar_select %p249_p12, %s1465_s11, %s2007_s20  }
  0x62   : > { %p2008_p7 = scmp.ne.s32.totalorder %s1998_s29, 0 }
  0x63   : > { %p2009_p9 = scmp.ne.s32.totalorder (!%p2008_p7), %s1991_s23, 0 }
  0x64   : > { %353 = sbr.rel (%p2008_p7) target bundleno = 1236 (0x4d4), region = 56 }
  0x6b   : > { %1444 = dma.done.wait (%p2009_p9), [#allocation4], 512  }
  0x6c   : > { %1446 = vsyncadd (%p2009_p9), [#allocation4], 4294966784  ;;  %s359_s21 = sand.u32 1, %s1473_s13   ;;  %p2010_p5 = scmp.ne.s32.totalorder %s1993_s26, 0 }
  0x6d   : > { %s1011_s12 = sshll.u32 %s359_s21, 5  ;;  %s360_s1 = scalar_lea.sflag [#allocation7], %s359_s21 }
  0x6e   : > { %s1761_s4 = scalar_lea.vmem [#allocation6], %s1011_s12 }
  0x6f   : > { %1448 = dma.done.wait (%p2010_p5), %s360_s1, 512  }
  0x70   : > { %1450 = vsyncadd (%p2010_p5), %s360_s1, 4294966784  ;;  %s403_s2 = sand.u32 1, %s1461_s10   ;;  %s1013_s23 = sshll.u32 %s1485_s16, 1 }
  0x71   : > { %s1771_s29 = sshll.u32 %s403_s2, 3  ;;  %p407_p12 = scmp.lt.s32.totalorder %s1013_s23, 3 }
  0x72   : > { %p412_p4 = scmp.lt.s32.totalorder %s1481_s15, 3  ;;  %s405_s21 = scalar_lea.vmem [#allocation8], %s1771_s29 }
  0x73   : > { %s2039_s23 = smov (!%p407_p12, %s1013_s23), 3  ;;  %p1015_p2 = scmp.ne.s32.totalorder %s1481_s15, 0 }
  0x74   : > { %s1775_s27 = scalar_select %p412_p4, %s1481_s15, 3 }
  0x75   : > { %s1014_s22 = sshll.u32 %s2039_s23, 3  ;;  %420 = sbr.rel (%p1015_p2) target bundleno = 985 (0x3d9), region = 68  ;;  %v1277_v0 = vld [vmem:[#allocation3] sm:$0xff] (!%p1015_p2)   ;;  %v1504_v1 = vmov (!%p1015_p2), 0.0   ;;  %v1278_v2 = vld [vmem:[#allocation3 + $0x8] sm:$0xff] (!%p1015_p2)   ;;  %vm1505_vm0 = vmmov (!%p1015_p2), 0  }
  0x76   : > { %s410_s19 = scalar_lea.vmem %s1958_s0, %s1014_s22  ;;  %s414_s20 = scalar_lea.vmem %s1966_s8, %s1775_s27  ;;  %1090 = vmatprep.subr.bf16.mxu0 (!%p1015_p2), %v1504_v1  ;;  %1102 = vmatprep.subr.bf16.mxu1 (!%p1015_p2), %v1504_v1  ;;  %v1281_v3 = vld [vmem:[%s1961_s3] sm:$0xff] (!%p1015_p2)   ;;  %v1279_v4 = vld [vmem:[#allocation3 + $0x10] sm:$0xff] (!%p1015_p2)   ;;  %vm463_vm1 = vcmask (!%p1015_p2), 523264   ;;  %v1282_v5 = vld [vmem:[%s1961_s3 + $0x8] sm:$0xff] (!%p1015_p2)  }
  0x77   : > { %1091 = vmatpush3.bf16.msra.mxu0 (!%p1015_p2), %v1277_v0  ;;  %1098 = vmatprep.mubr.msk.bf16.mxu0 (!%p1015_p2), %vm1505_vm0, %v1504_v1  ;;  %v1280_v6 = vld [vmem:[#allocation3 + $0x18] sm:$0xff] (!%p1015_p2)   ;;  %v422_v8 = vld [vmem:[%s410_s19 + $0x8] sm:$0xff] (!%p1015_p2)  ;;  %v1283_v10 = vld [vmem:[%s1961_s3 + $0x10] sm:$0xff] (!%p1015_p2)   ;;  %s2011_s26 = sld [smem:[#allocation18_spill]] (!%p1015_p2)  ;;  %s2012_s1 = sld [smem:[#allocation19_spill]] (!%p1015_p2) }
  0x78   : > { %1092 = vmatprep.subr.bf16.mxu0 (!%p1015_p2), %v1504_v1  ;;  %1118 = vmatprep.mubr.msk.bf16.mxu1 (!%p1015_p2), %vm1505_vm0, %v1504_v1  ;;  %v421_v7 = vld [vmem:[%s410_s19] sm:$0xff] (!%p1015_p2)  ;;  %v1284_v11 = vld [vmem:[%s1961_s3 + $0x18] sm:$0xff] (!%p1015_p2)   ;;  %v1286_v13 = vld [vmem:[%s1961_s3 + $0x28] sm:$0xff] (!%p1015_p2)  }
  0x79   : > { %1103 = vmatpush3.bf16.msra.mxu1 (!%p1015_p2), %v1281_v3  ;;  %v423_v9 = vpack.c.bf16 (!%p1015_p2), %v422_v8, %v421_v7  ;;  %v1285_v12 = vld [vmem:[%s1961_s3 + $0x20] sm:$0xff] (!%p1015_p2)   ;;  %v1287_v14 = vld [vmem:[%s1961_s3 + $0x30] sm:$0xff] (!%p1015_p2)   ;;  %v1288_v15 = vld [vmem:[%s1961_s3 + $0x38] sm:$0xff] (!%p1015_p2)  }
  0x7a   : > { %1104 = vmatprep.subr.bf16.mxu1 (!%p1015_p2), %v1504_v1  ;;  %v1289_v16 = vld [vmem:[%s1963_s5] sm:$0xff] (!%p1015_p2)   ;;  %v1290_v17 = vld [vmem:[%s1963_s5 + $0x8] sm:$0xff] (!%p1015_p2)   ;;  %v1291_v36 = vld [vmem:[%s1963_s5 + $0x10] sm:$0xff] (!%p1015_p2)  }
  0x7b   : > { %1093 = vmatpush3.bf16.msra.mxu0 (!%p1015_p2), %v1278_v2  ;;  %v1292_v37 = vld [vmem:[%s1963_s5 + $0x18] sm:$0xff] (!%p1015_p2)   ;;  %v1293_v38 = vld [vmem:[%s1963_s5 + $0x20] sm:$0xff] (!%p1015_p2)   ;;  %v1294_v39 = vld [vmem:[%s1963_s5 + $0x28] sm:$0xff] (!%p1015_p2)  }
  0x7c   : > { %1094 = vmatprep.subr.bf16.mxu0 %v1504_v1  ;;  %v1295_v40 = vld [vmem:[%s1963_s5 + $0x30] sm:$0xff]   ;;  %v1296_v41 = vld [vmem:[%s1963_s5 + $0x38] sm:$0xff]  }
  0x7d   : > { %1105 = vmatpush3.bf16.msra.mxu1 %v1282_v5  ;;  %v1016_v18 = vld [vmem:[%s2011_s26] ss:$0 sm:$0xff]  ;;  %s2013_s26 = sld [smem:[#allocation20_spill]] }
  0x7e   : > { %1106 = vmatprep.subr.bf16.mxu1 %v1504_v1  ;;  %v1022_v42 = vld [vmem:[%s2012_s1] ss:$0 sm:$0xff] }
  0x7f   : > { %1095 = vmatpush3.bf16.msra.mxu0 %v1279_v4 }
  0x80   : > { %1096 = vmatprep.subr.bf16.mxu0 %v1504_v1 }
  0x81   : > { %1107 = vmatpush3.bf16.msra.mxu1 %v1283_v10 }
  0x82   : > { %1108 = vmatprep.subr.bf16.mxu1 %v1504_v1 }
  0x83   : > { %1097 = vmatpush3.bf16.msra.mxu0 %v1280_v6  ;;  %v1031_v60 = vld [vmem:[%s2013_s26] ss:$0 sm:$0xff] }
  0x84   : > { %1122 = vmatprep.subr.bf16.mxu0 %v1504_v1 }
  0x85   : > { %1109 = vmatpush3.bf16.msra.mxu1 %v1284_v11 }
  0x86   : > { %1099 = vmatmul.mubr.msk.bf16.vlgmr.msra.gmra.mrb[0].mxu0 %vm463_vm1, %v423_v9  ;;  %1110 = vmatprep.subr.bf16.mxu1 %v1504_v1 }
  0x87   : > { %1138 = vmatprep.mubr.msk.bf16.mxu0 %vm1505_vm0, %v1504_v1  ;;  %1123 = vmatpush3.bf16.msra.mxu0 %v1289_v16 }
  0x88   : > { %1124 = vmatprep.subr.bf16.mxu0 %v1504_v1 }
  0x89   : > { %1111 = vmatpush3.bf16.msra.mxu1 %v1285_v12 }
  0x8a   : > { %1112 = vmatprep.subr.bf16.mxu1 %v1504_v1 }
  0x8b   : > { %1125 = vmatpush3.bf16.msra.mxu0 %v1290_v17 }
  0x8c   : > { %1126 = vmatprep.subr.bf16.mxu0 %v1504_v1 }
  0x8d   : > { %1113 = vmatpush3.bf16.msra.mxu1 %v1286_v13 }
  0x8e   : > { %1114 = vmatprep.subr.bf16.mxu1 %v1504_v1 }
  0x8f   : > { %1127 = vmatpush3.bf16.msra.mxu0 %v1291_v36 }
  0x90   : > { %1128 = vmatprep.subr.bf16.mxu0 %v1504_v1 }
  0x91   : > { %1115 = vmatpush3.bf16.msra.mxu1 %v1287_v14 }
  0x92   : > { %1116 = vmatprep.subr.bf16.mxu1 %v1504_v1 }
  0x93   : > { %1129 = vmatpush3.bf16.msra.mxu0 %v1292_v37 }
  0x94   : > { %1130 = vmatprep.subr.bf16.mxu0 %v1504_v1 }
  0x95   : > { %1117 = vmatpush3.bf16.msra.mxu1 %v1288_v15 }
  0x97   : > { %1131 = vmatpush3.bf16.msra.mxu0 %v1293_v38 }
  0x98   : > { %1132 = vmatprep.subr.bf16.mxu0 %v1504_v1 }
  0x9b   : > { %1133 = vmatpush3.bf16.msra.mxu0 %v1294_v39 }
  0x9c   : > { %1134 = vmatprep.subr.bf16.mxu0 %v1504_v1 }
  0x9f   : > { %1135 = vmatpush3.bf16.msra.mxu0 %v1295_v40 }
  0xa0   : > { %1136 = vmatprep.subr.bf16.mxu0 %v1504_v1 }
  0xa3   : > { %1137 = vmatpush3.bf16.msra.mxu0 %v1296_v41 }
 0x159   : > { %v501_v19 = vpop.f32.mrb[0].mxu0 }
 0x15a   : > { %v502_v20 = vadd.f32 %v1016_v18, %v501_v19  ;;  %v1100_v21 = vpop.f32.mrb[1].mxu0 }
 0x15b   : > { %v504_v22 = vpop.f32.mrb[2].mxu0 }
 0x15c   : > { %v510_v23 = vmul.f32 0.70710677, %v502_v20  ;;  %v505_v24 = vadd.f32 %v1016_v18, %v504_v22  ;;  %v1101_v25 = vpop.f32.mrb[3].mxu0  ;;  %v508_v30 = vmul.f32 0.5, %v502_v20 }
 0x15e   : > { %1297 = verf.f32 %v510_v23  ;;  %v511_v26 = vmul.f32 0.70710677, %v505_v24  ;;  %v509_v31 = vmul.f32 0.5, %v505_v24 }
 0x160   : > { %1299 = verf.f32 %v511_v26 }
 0x168   : > { %v1298_v27 = vpop.eup %1297 }
 0x169   : > { %v514_v28 = vadd.f32 1.0, %v1298_v27 }
 0x16a   : > { %v1300_v29 = vpop.eup %1299 }
 0x16b   : > { %v515_v32 = vadd.f32 1.0, %v1300_v29  ;;  %v516_v33 = vmul.f32 %v514_v28, %v508_v30 }
 0x16d   : > { %v517_v34 = vmul.f32 %v515_v32, %v509_v31 }
 0x16f   : > { %v518_v35 = vpack.c.bf16 %v517_v34, %v516_v33 }
 0x171   : > { %1119 = vmatmul.mubr.bf16.vlgmr.msra.gmra.mrb[0].mxu1 %v518_v35 }
 0x244   : > { %v624_v43 = vpop.f32.mrb[0].mxu1 }
 0x245   : > { %v625_v44 = vadd.f32 %v1022_v42, %v624_v43  ;;  %v1120_v45 = vpop.f32.mrb[1].mxu1 }
 0x246   : > { %v627_v46 = vpop.f32.mrb[2].mxu1 }
 0x247   : > { %v633_v47 = vmul.f32 0.70710677, %v625_v44  ;;  %v628_v48 = vadd.f32 %v1022_v42, %v627_v46  ;;  %v1121_v49 = vpop.f32.mrb[3].mxu1  ;;  %v631_v54 = vmul.f32 0.5, %v625_v44 }
 0x249   : > { %1301 = verf.f32 %v633_v47  ;;  %v634_v50 = vmul.f32 0.70710677, %v628_v48  ;;  %v632_v55 = vmul.f32 0.5, %v628_v48 }
 0x24b   : > { %1303 = verf.f32 %v634_v50 }
 0x253   : > { %v1302_v51 = vpop.eup %1301 }
 0x254   : > { %v637_v52 = vadd.f32 1.0, %v1302_v51 }
 0x255   : > { %v1304_v53 = vpop.eup %1303 }
 0x256   : > { %v638_v56 = vadd.f32 1.0, %v1304_v53  ;;  %v639_v57 = vmul.f32 %v637_v52, %v631_v54 }
 0x258   : > { %v640_v58 = vmul.f32 %v638_v56, %v632_v55 }
 0x25a   : > { %v641_v59 = vpack.c.bf16 %v640_v58, %v639_v57 }
 0x25c   : > { %1139 = vmatmul.mubr.bf16.vlgmr.msra.gmra.mrb[4].mxu0 %v641_v59 }
 0x32f   : > { %v747_v61 = vpop.f32.mrb[4].mxu0 }
 0x330   : > { %v748_v62 = vadd.f32 %v1031_v60, %v747_v61  ;;  %v1140_v63 = vpop.f32.mrb[5].mxu0 }
 0x331   : > { %v750_v0 = vpop.f32.mrb[6].mxu0 }
 0x332   : > { %v751_v1 = vadd.f32 %v1031_v60, %v750_v0  ;;  %v1141_v2 = vpop.f32.mrb[7].mxu0  ;;  %v754_v3 = vmul.f32 %v748_v62, %v748_v62 }
 0x334   : > { %v756_v4 = vsel %vm463_vm1, %v754_v3, 0.0  ;;  %v755_v5 = vmul.f32 %v751_v1, %v751_v1 }
 0x335   : > { %757 = vadd.xlane.f32.xlu0 %v756_v4 }
 0x336   : > { %v759_v6 = vsel %vm463_vm1, %v755_v5, 0.0 }
 0x339   : > { %760 = vadd.xlane.f32.xlu0 %v759_v6 }
 0x3c2   : > { %v758_v7 = vpop.xlane.xlu0 %757 }
 0x3c3   : > { %v762_v8 = vmax.f32 %v758_v7, 1e-24 }
 0x3c5   : > { %1305 = vrsqrt.f32 %v762_v8 }
 0x3c6   : > { %v761_v9 = vpop.xlane.xlu0 %760 }
 0x3c7   : > { %v763_v10 = vmax.f32 %v761_v9, 1e-24 }
 0x3c9   : > { %1307 = vrsqrt.f32 %v763_v10 }
 0x3cf   : > { %v1306_v11 = vpop.eup %1305 }
 0x3d0   : > { %v766_v13 = vmul.f32 %v1306_v11, %v748_v62 }
 0x3d3   : > { %v1308_v12 = vpop.eup %1307 }
 0x3d4   : > { %v767_v14 = vmul.f32 %v1308_v12, %v751_v1 }
 0x3d6   : > { %v768_v15 = vpack.c.bf16 %v767_v14, %v766_v13 }
 0x3d8   : > { %769 = vst.msk [vmem:[#allocation2] sm:$0xff] %vm463_vm1, %v768_v15 }
 0x3d9 PF: > { %v1309_v16 = vld [vmem:[%s1761_s4] sm:$0xff]   ;;  %v1506_v17 = vmov 0.0   ;;  %v1310_v18 = vld [vmem:[%s1761_s4 + $0x8] sm:$0xff]   ;;  %vm1507_vm2 = vmmov 0   ;;  %v1311_v19 = vld [vmem:[%s1761_s4 + $0x10] sm:$0xff]   ;;  %vm803_vm3 = vcmask 523264  }
 0x3da   : > { %1142 = vmatprep.subr.bf16.mxu0 %v1506_v17  ;;  %1150 = vmatprep.mubr.msk.bf16.mxu0 %vm1507_vm2, %v1506_v17  ;;  %v1312_v20 = vld [vmem:[%s1761_s4 + $0x18] sm:$0xff]   ;;  %s1056_s25 = sshll.u32 %s1485_s16, 3  ;;  %s2014_s12 = sld [smem:[#allocation14_spill]] }
 0x3db   : > { %1143 = vmatpush3.bf16.msra.mxu0 %v1309_v16  ;;  %s880_s19 = sadd.s32 %s1481_s15, %s1056_s25  ;;  %v1045_v23 = vld [vmem:[%s414_s20] ss:$0 sm:$0xff]  ;;  %s883_s4 = sshll.u32 %s405_s21, 4  ;;  %s1891_s4 = int_to_ptr.vmem [resolvable:$true] %s883_s4 }
 0x3dc   : > { %1144 = vmatprep.subr.bf16.mxu0 %v1506_v17  ;;  %s1051_s1 = sshll.u32 %s880_s19, 6  ;;  %s2015_s26 = sld [smem:[#allocation21_spill]] }
 0x3dd   : > { %s1897_s15 = scalar_lea.sflag [#allocation5], %s403_s2  ;;  %s1371_s27 = scalar_lea.vmem %s1891_s4, 128 }
 0x3de   : > { %p1372_p3 = scmp.ne.s32.totalorder %s1891_s4, %s1371_s27  ;;  %s1508_s20 = smov [#allocation8]  }
 0x3df   : > { %1145 = vmatpush3.bf16.msra.mxu0 %v1310_v18  ;;  %v770_v21 = vld [vmem:[#allocation2] sm:$0xff]  ;;  %s1375_s25 = sshll.u32 %s1508_s20, 4  ;;  %s1376_s25 = int_to_ptr.vmem [resolvable:$false] %s1375_s25 }
 0x3e0   : > { %1146 = vmatprep.subr.bf16.mxu0 %v1506_v17  ;;  %p2016_p6 = scmp.ne.s32.totalorder %s2014_s12, 0  ;;  %s1377_s19 = scalar_lea.vmem %s1376_s25, 256 }
 0x3e1   : > { %p1378_p8 = scmp.lt.s32.totalorder %s1891_s4, %s1376_s25  ;;  %p1379_p11 = scmp.lt.s32.totalorder %s1377_s19, %s1371_s27 }
 0x3e2   : > { %s1889_s16 = scalar_lea.hbm %s2015_s26, %s1051_s1  ;;  %p1373_p10 = pnand %p1372_p3, %p2016_p6 }
 0x3e3   : > { %1147 = vmatpush3.bf16.msra.mxu0 %v1311_v19  ;;  %p1380_p13 = por %p1379_p11, %p1378_p8 }
 0x3e4   : > { %1148 = vmatprep.subr.bf16.mxu0 %v1506_v17  ;;  %p1374_p0 = pneg %p1373_p10 }
 0x3e6   : > { %p1381_p1 = pnand %p1380_p13, %p1374_p0 }
 0x3e7   : > { %1149 = vmatpush3.bf16.msra.mxu0 %v1312_v20 }
 0x3ea   : > { %1151 = vmatmul.mubr.msk.bf16.vlgmr.msra.gmra.mrb[0].mxu0 %vm803_vm3, %v770_v21 }
 0x4bd   : > { %v841_v22 = vpop.f32.mrb[0].mxu0 }
 0x4be   : > { %v1152_v24 = vpop.f32.mrb[1].mxu0  ;;  %v855_v26 = vmul.f32 %v1045_v23, %v841_v22 }
 0x4bf   : > { %v844_v25 = vpop.f32.mrb[2].mxu0 }
 0x4c0   : > { %v856_v27 = vmul.f32 %v1045_v23, %v844_v25  ;;  %v1153_v28 = vpop.f32.mrb[3].mxu0 }
 0x4c2   : > { %v1060_v29 = vpack.c.bf16 %v856_v27, %v855_v26 }
 0x4c4   : > { %1061 = vst [vmem:[%s405_s21] sm:$0xff] %v1060_v29  }
 0x4c5   : > { %1384 = shalt.err (!%p1381_p1)
}
 0x4c6   : > { %s1385_s2 = scalar_lea.hbm %s1889_s16, 128  ;;  %s1389_s6 = scalar_lea.hbm %s2015_s26, 1024 }
 0x4c7   : > { %p1386_p7 = scmp.ne.s32.totalorder %s1889_s16, %s1385_s2  ;;  %p1390_p12 = scmp.lt.u32.totalorder %s1889_s16, %s2015_s26 }
 0x4c8   : > { %p1391_p4 = scmp.lt.u32.totalorder %s1389_s6, %s1385_s2  ;;  %p1393_p3 = scmp.lt.u32.totalorder %s1385_s2, %s1889_s16 }
 0x4c9   : > { %p1387_p9 = pnand %p1386_p7, %p2016_p6 }
 0x4ca   : > { %p1392_p2 = por %p1391_p4, %p1390_p12 }
 0x4cb   : > { %p1388_p5 = pneg %p1387_p9 }
 0x4cc   : > { %p1394_p10 = por %p1393_p3, %p1392_p2 }
 0x4ce   : > { %p1395_p0 = pnand %p1394_p10, %p1388_p5 }
 0x4d0   : > { %1398 = shalt.err (!%p1395_p0)
}
 0x4d1   : > { %s1509_s23 = smov 64   ;;  %s1510_s22 = smov 256  }
 0x4d2   : > { %s1511_s27 = smov 4  }
 0x4d3   : > { %1160 = dma.vmem_to_hbm [thread:$0]  (%p2016_p6), %s1891_s4, 128, %s1889_s16, %s1897_s15, %s1509_s23, %s1510_s22, %s1511_s27  }
 0x4d4 PF: > { %s2017_s20 = sld [smem:[#allocation13_spill]]  ;;  %s2018_s25 = sld [smem:[#allocation12_spill]] }
 0x4d5   : > { %s2019_s19 = sld [smem:[#allocation15_spill]] }
 0x4da   : > { %p1177_p8 = scmp.ge.s32.totalorder %s2017_s20, 2  ;;  %s898_s29 = sand.u32 1, %s2018_s25  }
 0x4db   : > { %p2020_p11 = scmp.ne.s32.totalorder %s2019_s19, 0  ;;  %s899_s2 = scalar_lea.sflag [#allocation5], %s898_s29 }
 0x4dd   : > { %p1171_p13 = pnand %p1177_p8, %p2020_p11 }
 0x4df   : > { %1452 = dma.done.wait (!%p1171_p13), %s899_s2, 128  }
 0x4e0   : > { %1454 = vsyncadd (!%p1171_p13), %s899_s2, 4294967168  ;;  %s26_s19 = sadd.s32 1, %s2017_s20   ;;  %s2021_s4 = sld [smem:[#allocation16_spill]] }
 0x4e1   : > { %p23_p1 = scmp.ge.s32.totalorder %s26_s19, 10   ;;  %s2022_s30 = smov %s1461_s10 }
 0x4e2   : > { %s2023_s10 = smov %s1465_s11  ;;  %s2024_s11 = smov %s1752_s24 }
 0x4e3   : > { %s2025_s12 = smov %s1473_s13  ;;  %s2026_s13 = smov %s1477_s14 }
 0x4e4   : > { %s2027_s14 = smov %s1703_s9  ;;  %s2028_s15 = smov %s1489_s17 }
 0x4e5   : > { %s2029_s16 = smov %s1493_s18  ;;  %s2031_s18 = smov %s2037_s28 }
 0x4e6   : > { %s2030_s17 = smov %s2021_s4  ;;  %25 = sbr.rel (!%p23_p1) target bundleno = 16 (0x10), region = 116 }
 0x4ed   :  { %904 = vsyncpa [#allocation4], 1 }
 0x4ee   :  { %906 = vsyncpa [#allocation4 + $0x1], 1 }
 0x4ef   :  { %907 = vsyncpa [#allocation7], 1 }
 0x4f0   :  { %909 = vsyncpa [#allocation7 + $0x1], 1 }
 0x4f1   :  { %910 = vsyncpa [#allocation5], 1 }
 0x4f2   :  { %912 = vsyncpa [#allocation5 + $0x1], 1 }

</bundles_post_ra>
